<compile_context>
chip_gen: v7x
topology: tpu7x:2x2x1
jax: 0.10.0
libtpu: 0.0.40
codegen_flags: <defaults>
</compile_context>

<pallas_src>
import jax
import jax.numpy as jnp
from jax.experimental import pallas as pl
from jax.experimental.pallas import tpu as pltpu


def _convblock_kernel(w_ref, b_ref, p_ref, o_ref):
    """Fused GEMM for one (image, lane-tile): (4d,16C)bf16 @ (16C,TM)bf16 + bias."""
    acc = jnp.dot(w_ref[...], p_ref[0],
                  preferred_element_type=jnp.float32)        # (4d, TM) f32
    o_ref[0] = (acc + b_ref[...]).astype(o_ref.dtype)        # (4d,1) lane-bcast


def _vmem_capacity_bytes():
    """Physical VMEM of the local generation (64 MiB fallback = v7x size)."""
    try:
        info = pltpu.get_tpu_info()
        cap = int(getattr(info, "vmem_capacity_bytes", 0))
        if cap > 0:
            return cap
    except Exception:
        pass
    return 64 * 1024 * 1024


def _choose_tile_m(hw, requested, c, dout, out_itemsize, budget):
    """Largest 128-multiple lane tile <= requested that fits the VMEM budget.

    Double-buffered per-step footprint:
        2 * tm * (16C * 2 [bf16 patches] + dout * out_itemsize [output tile])
      + 2 * (dout * 16C * 2 + dout * 4)  [grid-invariant packed weight + bias]
    No artificial tile shrinking to manufacture extra grid steps: the batch
    grid axis already provides parallel steps for v7x's two TensorCores, and
    on single-TC v5e/v6e smaller tiles only add per-step pipeline overhead.
    """
    hw_up = pl.cdiv(hw, 128) * 128
    t = min(max(128, (requested // 128) * 128), hw_up)
    fixed = 2 * (dout * 16 * c * 2 + dout * 4)
    per_lane = 2 * (16 * c * 2 + dout * out_itemsize)
    while t > 128 and fixed + per_lane * t > budget:
        t -= 128
    return t


def conv_block_forward(x_nchw, params, *, tile_m=2048, out_dtype=jnp.float32):
    """ConvBlock forward: 4 'same' convs (k=1..4) concatenated on channels.

    x_nchw: (N, C, H, W) float32 -> (N, 4*d, H, W) out_dtype (f32 default).
    """
    n, c, h, w = x_nchw.shape
    d = params[0][0].shape[0]
    dout = 4 * d
    hw = h * w

    # ---- host glue: shared bf16 im2col slab, batch-major --------------------
    # 'same' padding for k=4 is (1, 2); the smaller kernels' taps are subsets
    # of this 4x4 window, so one padded copy serves all four branches.  Cast
    # to bf16 FIRST so the pad/slice/stack fusion reads f32 x once and writes
    # a bf16 slab.
    xb = x_nchw.astype(jnp.bfloat16)
    xp = jnp.pad(xb, ((0, 0), (0, 0), (1, 2), (1, 2)))
    taps = [xp[:, :, ty:ty + h, tx:tx + w]                    # each (N, C, H, W)
            for ty in range(4) for tx in range(4)]
    pt = jnp.stack(taps, axis=1).reshape(n, 16 * c, hw)       # (N, 16C, H*W)

    # Pack branch weights into one (4d, 16C) bf16 matrix (unused taps stay
    # zero) and the biases into (4d, 1) f32.
    wpk = jnp.zeros((dout, 4, 4, c), jnp.float32)
    bpk = jnp.zeros((dout, 1), jnp.float32)
    for i, k in enumerate((1, 2, 3, 4)):
        wt, bs = params[i]                                    # (d, C, k, k), (d,)
        off = 1 - (k - 1) // 2        # branch tap offset inside the 4x4 window
        wkkc = jnp.transpose(wt, (0, 2, 3, 1))                # (d, k, k, C)
        wpk = wpk.at[i * d:(i + 1) * d, off:off + k, off:off + k, :].set(wkkc)
        bpk = bpk.at[i * d:(i + 1) * d, 0].set(bs)
    wpk = wpk.reshape(dout, 16 * c).astype(jnp.bfloat16)

    # ---- tiling --------------------------------------------------------------
    out_itemsize = jnp.dtype(out_dtype).itemsize
    vmem_budget = min(3 * _vmem_capacity_bytes() // 4, 96 * 1024 * 1024)
    tm = _choose_tile_m(hw, tile_m, c, dout, out_itemsize, vmem_budget)
    m_tiles = pl.cdiv(hw, tm)
    hw_pad = m_tiles * tm
    if hw_pad != hw:
        pt = jnp.pad(pt, ((0, 0), (0, 0), (0, hw_pad - hw)))  # zero lane padding

    out = pl.pallas_call(
        _convblock_kernel,
        out_shape=jax.ShapeDtypeStruct((n, dout, hw_pad), out_dtype),
        grid_spec=pltpu.PrefetchScalarGridSpec(
            num_scalar_prefetch=0,
            grid=(n, m_tiles),
            in_specs=[
                pl.BlockSpec((dout, 16 * c), lambda b, r: (0, 0)),     # packed W
                pl.BlockSpec((dout, 1), lambda b, r: (0, 0)),          # packed b
                pl.BlockSpec((1, 16 * c, tm), lambda b, r: (b, 0, r)),  # patches
            ],
            out_specs=pl.BlockSpec((1, dout, tm), lambda b, r: (b, 0, r)),
        ),
        compiler_params=pltpu.CompilerParams(
            dimension_semantics=("parallel", "parallel"),
            vmem_limit_bytes=int(vmem_budget)),
    )(wpk, bpk, pt)

    if hw_pad != hw:
        out = out[:, :, :hw]                                   # drop lane padding
    return out.reshape(n, dout, h, w)        # batch-major already -> free reshape


def init_params(key, input_dim, output_dim):
    """Deterministic synthetic params (PyTorch-style uniform fan-in bound)."""
    d = output_dim // 4
    params = []
    for k in (1, 2, 3, 4):
        key, kw, kb = jax.random.split(key, 3)
        fan_in = input_dim * k * k
        bound = 1.0 / (fan_in ** 0.5)
        wt = jax.random.uniform(kw, (d, input_dim, k, k), jnp.float32,
                                -bound, bound)
        bs = jax.random.uniform(kb, (d,), jnp.float32, -bound, bound)
        params.append((wt, bs))
    return params


def conv_block_reference(x_nchw, params):
    """Plain-JAX f32 reference reproducing PyTorch Conv2d(padding='same')."""
    outs = []
    for i, k in enumerate((1, 2, 3, 4)):
        wt, bs = params[i]
        total = k - 1
        lo = total // 2
        hi = total - lo
        y = jax.lax.conv_general_dilated(
            x_nchw, wt, window_strides=(1, 1),
            padding=[(lo, hi), (lo, hi)],
            dimension_numbers=('NCHW', 'OIHW', 'NCHW'))
        outs.append(y + bs[None, :, None, None])
    return jnp.concatenate(outs, axis=1)


if __name__ == "__main__":
    N, C, H, W = 2, 4, 16, 16     # input_dim = 4
    OUTPUT_DIM = 16               # d = 4 per branch

    key = jax.random.PRNGKey(0)
    kx, kp = jax.random.split(key)
    x = jax.random.normal(kx, (N, C, H, W), jnp.float32)
    params = init_params(kp, C, OUTPUT_DIM)

    fwd = jax.jit(conv_block_forward)
    out = jax.block_until_ready(fwd(x, params))

    ref = conv_block_reference(x, params)
    assert out.shape == (N, OUTPUT_DIM, H, W), out.shape
    err = float(jnp.max(jnp.abs(out - ref)))
    # bf16 operands with f32 accumulation vs f32 reference -> loose tolerance.
    assert err < 5e-2, f"max abs err {err}"
    print("KERNEL_OK")
</pallas_src>

<mosaic_0001>
module attributes {stable_mosaic.version = 11 : i64} {
  func.func @_convblock_kernel(%arg0: i32, %arg1: i32, %arg2: memref<16x64xbf16, #tpu.memory_space<vmem>>, %arg3: memref<16x1xf32, #tpu.memory_space<vmem>>, %arg4: memref<1x64x256xbf16, #tpu.memory_space<vmem>>, %arg5: memref<1x16x256xf32, #tpu.memory_space<vmem>>) attributes {dimension_semantics = [#tpu.dimension_semantics<parallel>, #tpu.dimension_semantics<parallel>], iteration_bounds = array<i64: 2, 1>, scalar_prefetch = 0 : i64, scratch_operands = 0 : i64, tpu.core_type = #tpu.core_type<tc>, window_params = [{pipeline_mode = #tpu.pipeline_mode<synchronous>, transform_indices = @transform_0, window_bounds = array<i64: 16, 64>}, {pipeline_mode = #tpu.pipeline_mode<synchronous>, transform_indices = @transform_1, window_bounds = array<i64: 16, 1>}, {transform_indices = @transform_2, window_bounds = array<i64: 1, 64, 256>}, {transform_indices = @transform_3, window_bounds = array<i64: 1, 16, 256>}]} {
    %c0 = arith.constant 0 : index
    %c0_0 = arith.constant 0 : index
    %0 = vector.load %arg2[%c0, %c0_0] : memref<16x64xbf16, #tpu.memory_space<vmem>>, vector<16x64xbf16>
    %c0_1 = arith.constant 0 : index
    %c0_2 = arith.constant 0 : index
    %c0_3 = arith.constant 0 : index
    %1 = vector.load %arg4[%c0_1, %c0_2, %c0_3] : memref<1x64x256xbf16, #tpu.memory_space<vmem>>, vector<1x64x256xbf16>
    %2 = vector.shape_cast %1 : vector<1x64x256xbf16> to vector<64x256xbf16>
    %cst = arith.constant dense<0.000000e+00> : vector<16x256xf32>
    %3 = tpu.matmul %0, %2, %cst {dimension_numbers = #tpu.dot_dimension_numbers<[1], [0], [0], [1], [0, 0, 1, 1], [], []>} : vector<16x64xbf16>, vector<64x256xbf16>, vector<16x256xf32> -> vector<16x256xf32>
    %c0_4 = arith.constant 0 : index
    %c0_5 = arith.constant 0 : index
    %4 = vector.load %arg3[%c0_4, %c0_5] : memref<16x1xf32, #tpu.memory_space<vmem>>, vector<16x1xf32>
    %5 = vector.broadcast %4 : vector<16x1xf32> to vector<16x256xf32>
    %6 = arith.addf %3, %5 : vector<16x256xf32>
    %c0_6 = arith.constant 0 : index
    %c0_7 = arith.constant 0 : index
    %c0_8 = arith.constant 0 : index
    %7 = vector.load %arg5[%c0_6, %c0_7, %c0_8] : memref<1x16x256xf32, #tpu.memory_space<vmem>>, vector<1x16x256xf32>
    %8 = vector.shape_cast %7 : vector<1x16x256xf32> to vector<16x256xf32>
    %9 = vector.shape_cast %6 : vector<16x256xf32> to vector<1x16x256xf32>
    tpu.vector_store %arg5[%c0_6, %c0_7, %c0_8], %9 {strides = array<i32>} : memref<1x16x256xf32, #tpu.memory_space<vmem>>, vector<1x16x256xf32>,
    return
  }
  func.func @transform_0(%arg0: i32, %arg1: i32) -> (i32, i32) {
    %c0_i32 = arith.constant 0 : i32
    %c0_i32_0 = arith.constant 0 : i32
    %c0_i32_1 = arith.constant 0 : i32
    return %c0_i32, %c0_i32_0 : i32, i32
  }
  func.func @transform_1(%arg0: i32, %arg1: i32) -> (i32, i32) {
    %c0_i32 = arith.constant 0 : i32
    %c0_i32_0 = arith.constant 0 : i32
    %c0_i32_1 = arith.constant 0 : i32
    return %c0_i32, %c0_i32_0 : i32, i32
  }
  func.func @transform_2(%arg0: i32, %arg1: i32) -> (i32, i32, i32) {
    %c0_i32 = arith.constant 0 : i32
    %c0_i32_0 = arith.constant 0 : i32
    return %arg0, %c0_i32, %arg1 : i32, i32, i32
  }
  func.func @transform_3(%arg0: i32, %arg1: i32) -> (i32, i32, i32) {
    %c0_i32 = arith.constant 0 : i32
    %c0_i32_0 = arith.constant 0 : i32
    return %arg0, %c0_i32, %arg1 : i32, i32, i32
  }
}

</mosaic_0001>

<bundles_post_ra>
// kernel: conv_block_forward.1
= control target key start
LH: loop header
LB: loop body
LE: loop exit
PB: predicated region body
PF: predicated region fallthrough
CT: control target
= control target key end

     0   :  { %s523_s12 = smov 0   ;;  %s525_s13 = smov 0   ;;  %s565_s0 = inlined_call_operand.vmem [shape: bf16[16,64], index: 0, kind: input, shape index: {}]   ;;  %s566_s1 = inlined_call_operand.vmem [shape: f32[16,1], index: 1, kind: input, shape index: {}]   ;;  %s567_s2 = inlined_call_operand.vmem [shape: bf16[2,64,256], index: 2, kind: input, shape index: {}]   ;;  %s568_s3 = inlined_call_operand.vmem [shape: f32[2,16,256], index: 3, kind: output, shape index: {}]  }
   0x1   :  { %s527_s14 = smov 0  }
   0x2 LB: > { %s25_s15 = sadd.s32 1, %s496_s13  ;;  %p420_p0 = scmp.ge.s32.totalorder %s500_s14, 1  ;;  %s500_s14 = sphi %s527_s14, %s13_s14   ;;  %s496_s13 = sphi %s525_s13, %s570_s13   ;;  %s492_s12 = sphi %s523_s12, %s569_s12  }
   0x3   : > { %p27_p1 = scmp.ge.s32.totalorder %s25_s15, 2  ;;  %p158_p2 = scmp.lt.s32.totalorder %s500_s14, 3 }
   0x5   : > { %s572_s15 = smov (%p27_p1, %s25_s15), 0  ;;  %p159_p3 = pnand %p420_p0, %p158_p2 }
   0x6   : > { %p191_p4 = scmp.lt.s32.totalorder (!%p159_p3), %s492_s12, 1  ;;  %v502_v0 = vmov (!%p159_p3), 0   ;;  %v221_v1 = vld [vmem:[%s566_s1] sm:$0xff] (!%p159_p3)  ;;  %v222_v2 = vld [vmem:[%s566_s1 + $0x8] sm:$0xff] (!%p159_p3)  ;;  %vm278_vm0 = vcmask (!%p159_p3), 523264  }
   0x7   : > { %162 = sbr.rel (%p159_p3) target bundleno = 252 (0xfc), region = 32  ;;  %314 = vmatprep.mubr.bf16.mxu0 (!%p159_p3), %v502_v0  ;;  %464 = vset.pattern.permute.xlu0 (!%p159_p3), %v502_v0  ;;  %v477_v11 = vld [vmem:[%s565_s0] sm:$0xff] (!%p159_p3)  }
   0x8   : > { %225 = vperm.xlu0 (!%p159_p3), %464, %v221_v1  }
   0xc   : > { %230 = vperm.xlu0 (!%p159_p3), %464, %v222_v2  }
   0xe   : > { %s574_s12 = smov (!%p191_p4, %s492_s12), 1 }
   0xf   : > { %s437_s20 = sshll.u32 %s574_s12, 6  ;;  %s438_s26 = sshll.u32 %s574_s12, 5 }
  0x10   : > { %s198_s23 = scalar_lea.vmem %s567_s2, %s437_s20  ;;  %s208_s29 = scalar_lea.vmem %s568_s3, %s438_s26 }
  0x11   : > { %v465_v3 = vld [vmem:[%s198_s23 + $0x4] ss:$8 sps:$4 sm:$0xff]   ;;  %v467_v4 = vld [vmem:[%s198_s23] ss:$8 sps:$4 sm:$0xff]   ;;  %v468_v5 = vld [vmem:[%s198_s23 + $0x14] ss:$8 sps:$4 sm:$0xff]  }
  0x12   : > { %282 = vmatprep.subr.bf16.mxu0 %v465_v3  ;;  %v470_v6 = vld [vmem:[%s198_s23 + $0x10] ss:$8 sps:$4 sm:$0xff]   ;;  %v471_v7 = vld [vmem:[%s198_s23 + $0x24] ss:$8 sps:$4 sm:$0xff]   ;;  %v473_v8 = vld [vmem:[%s198_s23 + $0x20] ss:$8 sps:$4 sm:$0xff]  }
  0x13   : > { %283 = vmatpush1.bf16.msra.mxu0 %v467_v4  ;;  %v474_v9 = vld [vmem:[%s198_s23 + $0x34] ss:$8 sps:$4 sm:$0xff]   ;;  %v476_v10 = vld [vmem:[%s198_s23 + $0x30] ss:$8 sps:$4 sm:$0xff]  }
  0x14   : > { %284 = vmatprep.subr.bf16.mxu0 %v468_v5 }
  0x17   : > { %285 = vmatpush1.bf16.msra.mxu0 %v470_v6 }
  0x18   : > { %286 = vmatprep.subr.bf16.mxu0 %v471_v7 }
  0x1b   : > { %287 = vmatpush1.bf16.msra.mxu0 %v473_v8 }
  0x1c   : > { %288 = vmatprep.subr.bf16.mxu0 %v474_v9 }
  0x1f   : > { %289 = vmatpush1.bf16.msra.mxu0 %v476_v10 }
  0x22   : > { %434 = vmatmul.mubr.msk.bf16.vlgmr.msra.gmra.mrb[0].mxu0 %vm278_vm0, %v477_v11 }
  0x87   : > { %v226_v12 = vpop.permute.xlu0 %225 }
  0x8b   : > { %v231_v16 = vpop.permute.xlu0 %230 }
  0xf5   : > { %v316_v13 = vpop.f32.mrb[0].mxu0 }
  0xf6   : > { %v317_v14 = vadd.f32 %v316_v13, %v226_v12  ;;  %v318_v15 = vpop.f32.mrb[1].mxu0 }
  0xf7   : > { %v319_v17 = vadd.f32 %v318_v15, %v226_v12  ;;  %v320_v18 = vpop.f32.mrb[2].mxu0 }
  0xf8   : > { %325 = vst [vmem:[%s208_s29] sm:$0xff] %v317_v14  ;;  %v321_v19 = vadd.f32 %v320_v18, %v231_v16  ;;  %v322_v20 = vpop.f32.mrb[3].mxu0 }
  0xf9   : > { %326 = vst [vmem:[%s208_s29 + $0x8] sm:$0xff] %v319_v17  ;;  %v323_v21 = vadd.f32 %v322_v20, %v231_v16 }
  0xfa   : > { %327 = vst [vmem:[%s208_s29 + $0x10] sm:$0xff] %v321_v19 }
  0xfb   : > { %328 = vst [vmem:[%s208_s29 + $0x18] sm:$0xff] %v323_v21 }
  0xfc PF: > { %s13_s14 = sadd.s32 1, %s500_s14   ;;  %s569_s12 = smov %s496_s13 }
  0xfd   : > { %p10_p5 = scmp.ge.s32.totalorder %s13_s14, 4   ;;  %s570_s13 = smov %s572_s15 }
  0xff   :  { %12 = sbr.rel (!%p10_p5) target bundleno = 2 (0x2), region = 62 }

</bundles_post_ra>
